<compile_context>
chip_gen: v5e
topology: v5e:2x2
jax: 0.10.0
libtpu: 0.0.40
codegen_flags: <defaults>
</compile_context>

<pallas_src>
import math

import jax
import jax.numpy as jnp
from jax.experimental import pallas as pl
from jax.experimental.pallas import tpu as pltpu


def _cdiv(a, b):
    return -(-a // b)


# ---------------------------------------------------------------------------
# Generation-aware block-size selection.
# ---------------------------------------------------------------------------

def _vmem_budget_and_limit():
    """Per-core VMEM capacity -> (block-selection budget, scoped vmem limit)."""
    capacity = 64 << 20          # conservative fallback = v7x per-TensorCore VMEM
    try:
        info = pltpu.get_tpu_info()
        capacity = int(getattr(info, "vmem_capacity_bytes", capacity)) or capacity
    except Exception:
        pass
    budget = int(capacity * 0.55)   # what the block picker plans against
    limit = int(capacity * 0.75)    # headroom for compiler temporaries / tile padding
    return budget, limit


def _module_block_candidates(num_modules, cap=16):
    """Module-block sizes G such that the (.., G, feat) blocks obey the (8,128) rule:
    G is a multiple of 8, or G == num_modules (full dim). `cap` bounds kernel unroll."""
    cands = set()
    if num_modules <= cap:
        cands.add(num_modules)
    g = 8
    while g < num_modules and g <= cap:
        cands.add(g)
        g += 8
    if not cands:
        cands.add(min(num_modules, 8))
    return sorted(cands, reverse=True)


def _block_footprint_bytes(tb, g, in_dims, out_dim, num_layers, w_bytes):
    """Estimated VMEM working set for one grid step: double-buffered blocks plus the
    live in-kernel activations (which the old estimate missed)."""
    x_blk = tb * g * in_dims[0] * 4
    w_blk = sum(g * d * out_dim * w_bytes for d in in_dims)
    b_blk = g * num_layers * out_dim * 4
    o_blk = tb * g * out_dim * 4
    live = 4 * tb * max(max(in_dims), out_dim) * 4       # h / acc temporaries (f32)
    return 2 * (x_blk + w_blk + b_blk + o_blk) + live


def _pick_blocks(batch, num_modules, in_dims, out_dim, num_layers, budget,
                 max_batch_tile, w_bytes):
    tb = batch if batch <= max_batch_tile else max_batch_tile
    g_cands = _module_block_candidates(num_modules)

    def fits(tb_, g_):
        return _block_footprint_bytes(tb_, g_, in_dims, out_dim, num_layers,
                                      w_bytes) <= budget

    while tb > 8 and not any(fits(tb, g) for g in g_cands):
        tb = max(8, tb // 2)
    fitting = [g for g in g_cands if fits(tb, g)] or [min(g_cands)]

    def steps(g_):
        return _cdiv(num_modules, g_) * _cdiv(batch, tb)

    # Prefer >=4 total grid steps (2 per TensorCore on v7x megacore), then >=2, else
    # simply the largest block that fits.
    for want in (4, 2):
        ok = [g for g in fitting if steps(g) >= want]
        if ok:
            return max(ok), tb
    return max(fitting), tb


# ---------------------------------------------------------------------------
# Kernel.
# ---------------------------------------------------------------------------

def _make_fused_mlp_kernel(num_layers, module_block, compute_dtype):
    def kernel(x_ref, *refs):
        # refs = (w_0, ..., w_{L-1}, bias, out)
        w_refs = refs[:num_layers]
        bias = refs[num_layers][...].astype(jnp.float32)       # (G, L, OUT), small
        o_ref = refs[num_layers + 1]
        for g in range(module_block):          # static unroll over modules in the block
            h = x_ref[:, g, :].astype(compute_dtype)            # (TB, IN)
            for l in range(num_layers):
                w = w_refs[l][g]                                 # (IN_l, OUT)
                acc = jnp.dot(h, w, preferred_element_type=jnp.float32)
                acc = acc + bias[g, l:l + 1, :]                  # f32 bias add
                if l < num_layers - 1:
                    h = jnp.tanh(acc).astype(compute_dtype)      # f32 tanh (EUP), cast for MXU
                else:
                    h = acc                                      # no tanh after last layer
            o_ref[:, g, :] = h.astype(o_ref.dtype)
    return kernel


def batch_mlp_fused(x, w_layers, bias_stack, *, out_dim,
                    compute_dtype=jnp.bfloat16, max_batch_tile=512):
    """Fused BatchMLP forward.

    x          : (B, M, IN) float32                        (torch layout, unmodified)
    w_layers[l]: (M, IN_l, OUT) compute dtype               (pre-transposed at init)
    bias_stack : (M, L, OUT) float32
    returns    : (B, M, OUT) float32
    """
    batch, num_modules, in_dim = x.shape
    num_layers = len(w_layers)
    in_dims = [int(w.shape[1]) for w in w_layers]
    assert in_dims[0] == in_dim

    budget, vmem_limit = _vmem_budget_and_limit()
    g_blk, tb = _pick_blocks(batch, num_modules, in_dims, out_dim, num_layers,
                             budget, max_batch_tile, w_layers[0].dtype.itemsize)
    # Batch axis innermost so weight blocks (module-indexed only) are revisited,
    # not re-DMA'd, across the batch tiles.
    grid = (_cdiv(num_modules, g_blk), _cdiv(batch, tb))

    in_specs = [pl.BlockSpec((tb, g_blk, in_dim), lambda m, b: (b, m, 0))]
    for w in w_layers:
        in_specs.append(
            pl.BlockSpec((g_blk, int(w.shape[1]), int(w.shape[2])),
                         lambda m, b: (m, 0, 0)))
    in_specs.append(
        pl.BlockSpec((g_blk, num_layers, out_dim), lambda m, b: (m, 0, 0)))
    out_specs = pl.BlockSpec((tb, g_blk, out_dim), lambda m, b: (b, m, 0))

    w_bytes = w_layers[0].dtype.itemsize
    flops = int(2 * batch * num_modules * sum(d * out_dim for d in in_dims))
    transcendentals = int(batch * num_modules * (num_layers - 1) * out_dim)
    bytes_accessed = int(x.size * 4
                         + sum(int(w.size) for w in w_layers) * w_bytes
                         + bias_stack.size * 4
                         + batch * num_modules * out_dim * 4)

    return pl.pallas_call(
        _make_fused_mlp_kernel(num_layers, g_blk, compute_dtype),
        out_shape=jax.ShapeDtypeStruct((batch, num_modules, out_dim), jnp.float32),
        grid_spec=pltpu.PrefetchScalarGridSpec(
            num_scalar_prefetch=0,
            grid=grid,
            in_specs=in_specs,
            out_specs=out_specs),
        compiler_params=pltpu.CompilerParams(
            dimension_semantics=("parallel", "parallel"),
            vmem_limit_bytes=vmem_limit),
        cost_estimate=pl.CostEstimate(
            flops=flops,
            transcendentals=transcendentals,
            bytes_accessed=bytes_accessed),
    )(x, *w_layers, bias_stack)


# ---------------------------------------------------------------------------
# Parameters / module wrapper / reference.
# ---------------------------------------------------------------------------

def init_batch_linear_params(key, in_features, out_features, num_modules):
    """Deterministic init mirroring BatchLinear.reset_parameters:
    stdv = 1/sqrt(weight.size(1)); torch weight is (M, out, in), so size(1)==out."""
    kw, kb = jax.random.split(key)
    stdv = 1.0 / math.sqrt(out_features)
    w = jax.random.uniform(kw, (num_modules, out_features, in_features),
                           jnp.float32, minval=-stdv, maxval=stdv)
    b = jax.random.uniform(kb, (num_modules, out_features),
                           jnp.float32, minval=-stdv, maxval=stdv)
    # TODO(synk): the original BatchMLP wraps layers with init(m, init_normc_, ...) from
    # an external helper not included in the spec; a deterministic uniform init is used.
    return w, b


class BatchMLPPallas:
    def __init__(self, input_sz, hid_sz, num_layer, num_modules, key,
                 compute_dtype=jnp.bfloat16):
        assert num_layer >= 2
        keys = jax.random.split(key, num_layer)
        in_dims = [input_sz] + [hid_sz] * (num_layer - 1)
        self.out_features = hid_sz
        self.compute_dtype = compute_dtype

        self.raw_layers = []   # torch-layout (M, OUT, IN) f32 weights + (M, OUT) biases
        w_kernel, b_list = [], []
        for l in range(num_layer):
            w, b = init_batch_linear_params(keys[l], in_dims[l], hid_sz, num_modules)
            self.raw_layers.append((w, b))
            # One-time re-layout: (M, OUT, IN) -> (M, IN, OUT), cast to compute dtype.
            w_kernel.append(jnp.transpose(w, (0, 2, 1)).astype(compute_dtype))
            b_list.append(b)
        self.w_kernel = w_kernel
        self.b_kernel = jnp.stack(b_list, axis=1).astype(jnp.float32)   # (M, L, OUT)

    def __call__(self, x_bmf, *, max_batch_tile=512):
        """x_bmf: (batch, num_modules, input_sz) -> (batch, num_modules, hid_sz)"""
        return batch_mlp_fused(x_bmf, self.w_kernel, self.b_kernel,
                               out_dim=self.out_features,
                               compute_dtype=self.compute_dtype,
                               max_batch_tile=max_batch_tile)


def reference_forward(raw_layers, x, compute_dtype=jnp.float32):
    """Pure-JAX reference of BatchMLP.forward (torch-layout weights).  With
    compute_dtype=bf16 it mirrors the kernel's mixed precision (bf16 MXU inputs,
    f32 accumulation, f32 bias + tanh)."""
    h = x
    n = len(raw_layers)
    for i, (w, b) in enumerate(raw_layers):
        h = jnp.einsum('bmi,moi->bmo',
                       h.astype(compute_dtype), w.astype(compute_dtype),
                       preferred_element_type=jnp.float32) + b[None, :, :]
        if i < n - 1:
            h = jnp.tanh(h)
    return h


if __name__ == "__main__":
    root_key = jax.random.PRNGKey(0)

    def run_case(case_id, batch, num_modules, input_sz, hid_sz, num_layer,
                 max_batch_tile=512, tol=1e-2):
        kp, kx = jax.random.split(jax.random.fold_in(root_key, case_id))
        model = BatchMLPPallas(input_sz, hid_sz, num_layer, num_modules, kp)
        x = jax.random.normal(kx, (batch, num_modules, input_sz), jnp.float32)
        out = jax.block_until_ready(model(x, max_batch_tile=max_batch_tile))
        ref = reference_forward(model.raw_layers, x, compute_dtype=model.compute_dtype)
        assert out.shape == (batch, num_modules, hid_sz), out.shape
        err = float(jnp.max(jnp.abs(out - ref)))
        assert err < tol, f"case {case_id}: max abs err {err}"

    # Required small demo config: batch=2, num_modules=4, input=8, hidden=32, 3 layers.
    run_case(0, batch=2, num_modules=4, input_sz=8, hid_sz=32, num_layer=3)
    # Multiple module blocks (module grid axis streams weight blocks).
    run_case(1, batch=4, num_modules=16, input_sz=8, hid_sz=32, num_layer=3)
    # Multiple batch blocks (weights revisited across the inner batch axis).
    run_case(2, batch=8, num_modules=8, input_sz=8, hid_sz=32, num_layer=3,
             max_batch_tile=4)

    print("KERNEL_OK")
</pallas_src>

<mosaic_0001>
module attributes {stable_mosaic.version = 11 : i64} {
  func.func @kernel(%arg0: i32, %arg1: i32, %arg2: memref<2x4x8xf32, #tpu.memory_space<vmem>>, %arg3: memref<4x8x32xbf16, #tpu.memory_space<vmem>>, %arg4: memref<4x32x32xbf16, #tpu.memory_space<vmem>>, %arg5: memref<4x32x32xbf16, #tpu.memory_space<vmem>>, %arg6: memref<4x3x32xf32, #tpu.memory_space<vmem>>, %arg7: memref<2x4x32xf32, #tpu.memory_space<vmem>>) attributes {dimension_semantics = [#tpu.dimension_semantics<parallel>, #tpu.dimension_semantics<parallel>], iteration_bounds = array<i64: 1, 1>, scalar_prefetch = 0 : i64, scratch_operands = 0 : i64, tpu.core_type = #tpu.core_type<tc>, window_params = [{transform_indices = @transform_0, window_bounds = array<i64: 2, 4, 8>}, {transform_indices = @transform_1, window_bounds = array<i64: 4, 8, 32>}, {transform_indices = @transform_2, window_bounds = array<i64: 4, 32, 32>}, {transform_indices = @transform_3, window_bounds = array<i64: 4, 32, 32>}, {transform_indices = @transform_4, window_bounds = array<i64: 4, 3, 32>}, {transform_indices = @transform_5, window_bounds = array<i64: 2, 4, 32>}]} {
    %c0 = arith.constant 0 : index
    %c0_0 = arith.constant 0 : index
    %c0_1 = arith.constant 0 : index
    %0 = vector.load %arg6[%c0, %c0_0, %c0_1] : memref<4x3x32xf32, #tpu.memory_space<vmem>>, vector<4x3x32xf32>
    %c0_2 = arith.constant 0 : index
    %c0_3 = arith.constant 0 : index
    %c0_4 = arith.constant 0 : index
    %1 = vector.load %arg2[%c0_2, %c0_3, %c0_4] : memref<2x4x8xf32, #tpu.memory_space<vmem>>, vector<2x1x8xf32>
    %2 = vector.shape_cast %1 : vector<2x1x8xf32> to vector<2x8xf32>
    %3 = arith.truncf %2 : vector<2x8xf32> to vector<2x8xbf16>
    %c0_5 = arith.constant 0 : index
    %c0_6 = arith.constant 0 : index
    %c0_7 = arith.constant 0 : index
    %4 = vector.load %arg3[%c0_5, %c0_6, %c0_7] : memref<4x8x32xbf16, #tpu.memory_space<vmem>>, vector<1x8x32xbf16>
    %5 = vector.shape_cast %4 : vector<1x8x32xbf16> to vector<8x32xbf16>
    %cst = arith.constant dense<0.000000e+00> : vector<2x32xf32>
    %6 = tpu.matmul %3, %5, %cst {dimension_numbers = #tpu.dot_dimension_numbers<[1], [0], [0], [1], [0, 0, 1, 1], [], []>} : vector<2x8xbf16>, vector<8x32xbf16>, vector<2x32xf32> -> vector<2x32xf32>
    %7 = vector.extract_strided_slice %0 {offsets = [0, 0, 0], sizes = [1, 1, 32], strides = [1, 1, 1]} : vector<4x3x32xf32> to vector<1x1x32xf32>
    %8 = vector.shape_cast %7 : vector<1x1x32xf32> to vector<1x32xf32>
    %9 = vector.broadcast %8 : vector<1x32xf32> to vector<2x32xf32>
    %10 = arith.addf %6, %9 : vector<2x32xf32>
    %11 = math.tanh %10 : vector<2x32xf32>
    %12 = arith.truncf %11 : vector<2x32xf32> to vector<2x32xbf16>
    %c0_8 = arith.constant 0 : index
    %c0_9 = arith.constant 0 : index
    %c0_10 = arith.constant 0 : index
    %13 = vector.load %arg4[%c0_8, %c0_9, %c0_10] : memref<4x32x32xbf16, #tpu.memory_space<vmem>>, vector<1x32x32xbf16>
    %14 = vector.shape_cast %13 : vector<1x32x32xbf16> to vector<32x32xbf16>
    %cst_11 = arith.constant dense<0.000000e+00> : vector<2x32xf32>
    %15 = tpu.matmul %12, %14, %cst_11 {dimension_numbers = #tpu.dot_dimension_numbers<[1], [0], [0], [1], [0, 0, 1, 1], [], []>} : vector<2x32xbf16>, vector<32x32xbf16>, vector<2x32xf32> -> vector<2x32xf32>
    %16 = vector.extract_strided_slice %0 {offsets = [0, 1, 0], sizes = [1, 1, 32], strides = [1, 1, 1]} : vector<4x3x32xf32> to vector<1x1x32xf32>
    %17 = vector.shape_cast %16 : vector<1x1x32xf32> to vector<1x32xf32>
    %18 = vector.broadcast %17 : vector<1x32xf32> to vector<2x32xf32>
    %19 = arith.addf %15, %18 : vector<2x32xf32>
    %20 = math.tanh %19 : vector<2x32xf32>
    %21 = arith.truncf %20 : vector<2x32xf32> to vector<2x32xbf16>
    %c0_12 = arith.constant 0 : index
    %c0_13 = arith.constant 0 : index
    %c0_14 = arith.constant 0 : index
    %22 = vector.load %arg5[%c0_12, %c0_13, %c0_14] : memref<4x32x32xbf16, #tpu.memory_space<vmem>>, vector<1x32x32xbf16>
    %23 = vector.shape_cast %22 : vector<1x32x32xbf16> to vector<32x32xbf16>
    %cst_15 = arith.constant dense<0.000000e+00> : vector<2x32xf32>
    %24 = tpu.matmul %21, %23, %cst_15 {dimension_numbers = #tpu.dot_dimension_numbers<[1], [0], [0], [1], [0, 0, 1, 1], [], []>} : vector<2x32xbf16>, vector<32x32xbf16>, vector<2x32xf32> -> vector<2x32xf32>
    %25 = vector.extract_strided_slice %0 {offsets = [0, 2, 0], sizes = [1, 1, 32], strides = [1, 1, 1]} : vector<4x3x32xf32> to vector<1x1x32xf32>
    %26 = vector.shape_cast %25 : vector<1x1x32xf32> to vector<1x32xf32>
    %27 = vector.broadcast %26 : vector<1x32xf32> to vector<2x32xf32>
    %28 = arith.addf %24, %27 : vector<2x32xf32>
    %c0_16 = arith.constant 0 : index
    %c0_17 = arith.constant 0 : index
    %c0_18 = arith.constant 0 : index
    %29 = vector.load %arg7[%c0_16, %c0_17, %c0_18] : memref<2x4x32xf32, #tpu.memory_space<vmem>>, vector<2x1x32xf32>
    %30 = vector.shape_cast %29 : vector<2x1x32xf32> to vector<2x32xf32>
    %31 = vector.shape_cast %28 : vector<2x32xf32> to vector<2x1x32xf32>
    tpu.vector_store %arg7[%c0_16, %c0_17, %c0_18], %31 {strides = array<i32>} : memref<2x4x32xf32, #tpu.memory_space<vmem>>, vector<2x1x32xf32>,
    %c0_19 = arith.constant 0 : index
    %c1 = arith.constant 1 : index
    %c0_20 = arith.constant 0 : index
    %32 = vector.load %arg2[%c0_19, %c1, %c0_20] : memref<2x4x8xf32, #tpu.memory_space<vmem>>, vector<2x1x8xf32>
    %33 = vector.shape_cast %32 : vector<2x1x8xf32> to vector<2x8xf32>
    %34 = arith.truncf %33 : vector<2x8xf32> to vector<2x8xbf16>
    %c1_21 = arith.constant 1 : index
    %c0_22 = arith.constant 0 : index
    %c0_23 = arith.constant 0 : index
    %35 = vector.load %arg3[%c1_21, %c0_22, %c0_23] : memref<4x8x32xbf16, #tpu.memory_space<vmem>>, vector<1x8x32xbf16>
    %36 = vector.shape_cast %35 : vector<1x8x32xbf16> to vector<8x32xbf16>
    %cst_24 = arith.constant dense<0.000000e+00> : vector<2x32xf32>
    %37 = tpu.matmul %34, %36, %cst_24 {dimension_numbers = #tpu.dot_dimension_numbers<[1], [0], [0], [1], [0, 0, 1, 1], [], []>} : vector<2x8xbf16>, vector<8x32xbf16>, vector<2x32xf32> -> vector<2x32xf32>
    %38 = vector.extract_strided_slice %0 {offsets = [1, 0, 0], sizes = [1, 1, 32], strides = [1, 1, 1]} : vector<4x3x32xf32> to vector<1x1x32xf32>
    %39 = vector.shape_cast %38 : vector<1x1x32xf32> to vector<1x32xf32>
    %40 = vector.broadcast %39 : vector<1x32xf32> to vector<2x32xf32>
    %41 = arith.addf %37, %40 : vector<2x32xf32>
    %42 = math.tanh %41 : vector<2x32xf32>
    %43 = arith.truncf %42 : vector<2x32xf32> to vector<2x32xbf16>
    %c1_25 = arith.constant 1 : index
    %c0_26 = arith.constant 0 : index
    %c0_27 = arith.constant 0 : index
    %44 = vector.load %arg4[%c1_25, %c0_26, %c0_27] : memref<4x32x32xbf16, #tpu.memory_space<vmem>>, vector<1x32x32xbf16>
    %45 = vector.shape_cast %44 : vector<1x32x32xbf16> to vector<32x32xbf16>
    %cst_28 = arith.constant dense<0.000000e+00> : vector<2x32xf32>
    %46 = tpu.matmul %43, %45, %cst_28 {dimension_numbers = #tpu.dot_dimension_numbers<[1], [0], [0], [1], [0, 0, 1, 1], [], []>} : vector<2x32xbf16>, vector<32x32xbf16>, vector<2x32xf32> -> vector<2x32xf32>
    %47 = vector.extract_strided_slice %0 {offsets = [1, 1, 0], sizes = [1, 1, 32], strides = [1, 1, 1]} : vector<4x3x32xf32> to vector<1x1x32xf32>
    %48 = vector.shape_cast %47 : vector<1x1x32xf32> to vector<1x32xf32>
    %49 = vector.broadcast %48 : vector<1x32xf32> to vector<2x32xf32>
    %50 = arith.addf %46, %49 : vector<2x32xf32>
    %51 = math.tanh %50 : vector<2x32xf32>
    %52 = arith.truncf %51 : vector<2x32xf32> to vector<2x32xbf16>
    %c1_29 = arith.constant 1 : index
    %c0_30 = arith.constant 0 : index
    %c0_31 = arith.constant 0 : index
    %53 = vector.load %arg5[%c1_29, %c0_30, %c0_31] : memref<4x32x32xbf16, #tpu.memory_space<vmem>>, vector<1x32x32xbf16>
    %54 = vector.shape_cast %53 : vector<1x32x32xbf16> to vector<32x32xbf16>
    %cst_32 = arith.constant dense<0.000000e+00> : vector<2x32xf32>
    %55 = tpu.matmul %52, %54, %cst_32 {dimension_numbers = #tpu.dot_dimension_numbers<[1], [0], [0], [1], [0, 0, 1, 1], [], []>} : vector<2x32xbf16>, vector<32x32xbf16>, vector<2x32xf32> -> vector<2x32xf32>
    %56 = vector.extract_strided_slice %0 {offsets = [1, 2, 0], sizes = [1, 1, 32], strides = [1, 1, 1]} : vector<4x3x32xf32> to vector<1x1x32xf32>
    %57 = vector.shape_cast %56 : vector<1x1x32xf32> to vector<1x32xf32>
    %58 = vector.broadcast %57 : vector<1x32xf32> to vector<2x32xf32>
    %59 = arith.addf %55, %58 : vector<2x32xf32>
    %c0_33 = arith.constant 0 : index
    %c1_34 = arith.constant 1 : index
    %c0_35 = arith.constant 0 : index
    %60 = vector.load %arg7[%c0_33, %c1_34, %c0_35] : memref<2x4x32xf32, #tpu.memory_space<vmem>>, vector<2x1x32xf32>
    %61 = vector.shape_cast %60 : vector<2x1x32xf32> to vector<2x32xf32>
    %62 = vector.shape_cast %59 : vector<2x32xf32> to vector<2x1x32xf32>
    tpu.vector_store %arg7[%c0_33, %c1_34, %c0_35], %62 {strides = array<i32>} : memref<2x4x32xf32, #tpu.memory_space<vmem>>, vector<2x1x32xf32>,
    %c0_36 = arith.constant 0 : index
    %c2 = arith.constant 2 : index
    %c0_37 = arith.constant 0 : index
    %63 = vector.load %arg2[%c0_36, %c2, %c0_37] : memref<2x4x8xf32, #tpu.memory_space<vmem>>, vector<2x1x8xf32>
    %64 = vector.shape_cast %63 : vector<2x1x8xf32> to vector<2x8xf32>
    %65 = arith.truncf %64 : vector<2x8xf32> to vector<2x8xbf16>
    %c2_38 = arith.constant 2 : index
    %c0_39 = arith.constant 0 : index
    %c0_40 = arith.constant 0 : index
    %66 = vector.load %arg3[%c2_38, %c0_39, %c0_40] : memref<4x8x32xbf16, #tpu.memory_space<vmem>>, vector<1x8x32xbf16>
    %67 = vector.shape_cast %66 : vector<1x8x32xbf16> to vector<8x32xbf16>
    %cst_41 = arith.constant dense<0.000000e+00> : vector<2x32xf32>
    %68 = tpu.matmul %65, %67, %cst_41 {dimension_numbers = #tpu.dot_dimension_numbers<[1], [0], [0], [1], [0, 0, 1, 1], [], []>} : vector<2x8xbf16>, vector<8x32xbf16>, vector<2x32xf32> -> vector<2x32xf32>
    %69 = vector.extract_strided_slice %0 {offsets = [2, 0, 0], sizes = [1, 1, 32], strides = [1, 1, 1]} : vector<4x3x32xf32> to vector<1x1x32xf32>
    %70 = vector.shape_cast %69 : vector<1x1x32xf32> to vector<1x32xf32>
    %71 = vector.broadcast %70 : vector<1x32xf32> to vector<2x32xf32>
    %72 = arith.addf %68, %71 : vector<2x32xf32>
    %73 = math.tanh %72 : vector<2x32xf32>
    %74 = arith.truncf %73 : vector<2x32xf32> to vector<2x32xbf16>
    %c2_42 = arith.constant 2 : index
    %c0_43 = arith.constant 0 : index
    %c0_44 = arith.constant 0 : index
    %75 = vector.load %arg4[%c2_42, %c0_43, %c0_44] : memref<4x32x32xbf16, #tpu.memory_space<vmem>>, vector<1x32x32xbf16>
    %76 = vector.shape_cast %75 : vector<1x32x32xbf16> to vector<32x32xbf16>
    %cst_45 = arith.constant dense<0.000000e+00> : vector<2x32xf32>
    %77 = tpu.matmul %74, %76, %cst_45 {dimension_numbers = #tpu.dot_dimension_numbers<[1], [0], [0], [1], [0, 0, 1, 1], [], []>} : vector<2x32xbf16>, vector<32x32xbf16>, vector<2x32xf32> -> vector<2x32xf32>
    %78 = vector.extract_strided_slice %0 {offsets = [2, 1, 0], sizes = [1, 1, 32], strides = [1, 1, 1]} : vector<4x3x32xf32> to vector<1x1x32xf32>
    %79 = vector.shape_cast %78 : vector<1x1x32xf32> to vector<1x32xf32>
    %80 = vector.broadcast %79 : vector<1x32xf32> to vector<2x32xf32>
    %81 = arith.addf %77, %80 : vector<2x32xf32>
    %82 = math.tanh %81 : vector<2x32xf32>
    %83 = arith.truncf %82 : vector<2x32xf32> to vector<2x32xbf16>
    %c2_46 = arith.constant 2 : index
    %c0_47 = arith.constant 0 : index
    %c0_48 = arith.constant 0 : index
    %84 = vector.load %arg5[%c2_46, %c0_47, %c0_48] : memref<4x32x32xbf16, #tpu.memory_space<vmem>>, vector<1x32x32xbf16>
    %85 = vector.shape_cast %84 : vector<1x32x32xbf16> to vector<32x32xbf16>
    %cst_49 = arith.constant dense<0.000000e+00> : vector<2x32xf32>
    %86 = tpu.matmul %83, %85, %cst_49 {dimension_numbers = #tpu.dot_dimension_numbers<[1], [0], [0], [1], [0, 0, 1, 1], [], []>} : vector<2x32xbf16>, vector<32x32xbf16>, vector<2x32xf32> -> vector<2x32xf32>
    %87 = vector.extract_strided_slice %0 {offsets = [2, 2, 0], sizes = [1, 1, 32], strides = [1, 1, 1]} : vector<4x3x32xf32> to vector<1x1x32xf32>
    %88 = vector.shape_cast %87 : vector<1x1x32xf32> to vector<1x32xf32>
    %89 = vector.broadcast %88 : vector<1x32xf32> to vector<2x32xf32>
    %90 = arith.addf %86, %89 : vector<2x32xf32>
    %c0_50 = arith.constant 0 : index
    %c2_51 = arith.constant 2 : index
    %c0_52 = arith.constant 0 : index
    %91 = vector.load %arg7[%c0_50, %c2_51, %c0_52] : memref<2x4x32xf32, #tpu.memory_space<vmem>>, vector<2x1x32xf32>
    %92 = vector.shape_cast %91 : vector<2x1x32xf32> to vector<2x32xf32>
    %93 = vector.shape_cast %90 : vector<2x32xf32> to vector<2x1x32xf32>
    tpu.vector_store %arg7[%c0_50, %c2_51, %c0_52], %93 {strides = array<i32>} : memref<2x4x32xf32, #tpu.memory_space<vmem>>, vector<2x1x32xf32>,
    %c0_53 = arith.constant 0 : index
    %c3 = arith.constant 3 : index
    %c0_54 = arith.constant 0 : index
    %94 = vector.load %arg2[%c0_53, %c3, %c0_54] : memref<2x4x8xf32, #tpu.memory_space<vmem>>, vector<2x1x8xf32>
    %95 = vector.shape_cast %94 : vector<2x1x8xf32> to vector<2x8xf32>
    %96 = arith.truncf %95 : vector<2x8xf32> to vector<2x8xbf16>
    %c3_55 = arith.constant 3 : index
    %c0_56 = arith.constant 0 : index
    %c0_57 = arith.constant 0 : index
    %97 = vector.load %arg3[%c3_55, %c0_56, %c0_57] : memref<4x8x32xbf16, #tpu.memory_space<vmem>>, vector<1x8x32xbf16>
    %98 = vector.shape_cast %97 : vector<1x8x32xbf16> to vector<8x32xbf16>
    %cst_58 = arith.constant dense<0.000000e+00> : vector<2x32xf32>
    %99 = tpu.matmul %96, %98, %cst_58 {dimension_numbers = #tpu.dot_dimension_numbers<[1], [0], [0], [1], [0, 0, 1, 1], [], []>} : vector<2x8xbf16>, vector<8x32xbf16>, vector<2x32xf32> -> vector<2x32xf32>
    %100 = vector.extract_strided_slice %0 {offsets = [3, 0, 0], sizes = [1, 1, 32], strides = [1, 1, 1]} : vector<4x3x32xf32> to vector<1x1x32xf32>
    %101 = vector.shape_cast %100 : vector<1x1x32xf32> to vector<1x32xf32>
    %102 = vector.broadcast %101 : vector<1x32xf32> to vector<2x32xf32>
    %103 = arith.addf %99, %102 : vector<2x32xf32>
    %104 = math.tanh %103 : vector<2x32xf32>
    %105 = arith.truncf %104 : vector<2x32xf32> to vector<2x32xbf16>
    %c3_59 = arith.constant 3 : index
    %c0_60 = arith.constant 0 : index
    %c0_61 = arith.constant 0 : index
    %106 = vector.load %arg4[%c3_59, %c0_60, %c0_61] : memref<4x32x32xbf16, #tpu.memory_space<vmem>>, vector<1x32x32xbf16>
    %107 = vector.shape_cast %106 : vector<1x32x32xbf16> to vector<32x32xbf16>
    %cst_62 = arith.constant dense<0.000000e+00> : vector<2x32xf32>
    %108 = tpu.matmul %105, %107, %cst_62 {dimension_numbers = #tpu.dot_dimension_numbers<[1], [0], [0], [1], [0, 0, 1, 1], [], []>} : vector<2x32xbf16>, vector<32x32xbf16>, vector<2x32xf32> -> vector<2x32xf32>
    %109 = vector.extract_strided_slice %0 {offsets = [3, 1, 0], sizes = [1, 1, 32], strides = [1, 1, 1]} : vector<4x3x32xf32> to vector<1x1x32xf32>
    %110 = vector.shape_cast %109 : vector<1x1x32xf32> to vector<1x32xf32>
    %111 = vector.broadcast %110 : vector<1x32xf32> to vector<2x32xf32>
    %112 = arith.addf %108, %111 : vector<2x32xf32>
    %113 = math.tanh %112 : vector<2x32xf32>
    %114 = arith.truncf %113 : vector<2x32xf32> to vector<2x32xbf16>
    %c3_63 = arith.constant 3 : index
    %c0_64 = arith.constant 0 : index
    %c0_65 = arith.constant 0 : index
    %115 = vector.load %arg5[%c3_63, %c0_64, %c0_65] : memref<4x32x32xbf16, #tpu.memory_space<vmem>>, vector<1x32x32xbf16>
    %116 = vector.shape_cast %115 : vector<1x32x32xbf16> to vector<32x32xbf16>
    %cst_66 = arith.constant dense<0.000000e+00> : vector<2x32xf32>
    %117 = tpu.matmul %114, %116, %cst_66 {dimension_numbers = #tpu.dot_dimension_numbers<[1], [0], [0], [1], [0, 0, 1, 1], [], []>} : vector<2x32xbf16>, vector<32x32xbf16>, vector<2x32xf32> -> vector<2x32xf32>
    %118 = vector.extract_strided_slice %0 {offsets = [3, 2, 0], sizes = [1, 1, 32], strides = [1, 1, 1]} : vector<4x3x32xf32> to vector<1x1x32xf32>
    %119 = vector.shape_cast %118 : vector<1x1x32xf32> to vector<1x32xf32>
    %120 = vector.broadcast %119 : vector<1x32xf32> to vector<2x32xf32>
    %121 = arith.addf %117, %120 : vector<2x32xf32>
    %c0_67 = arith.constant 0 : index
    %c3_68 = arith.constant 3 : index
    %c0_69 = arith.constant 0 : index
    %122 = vector.load %arg7[%c0_67, %c3_68, %c0_69] : memref<2x4x32xf32, #tpu.memory_space<vmem>>, vector<2x1x32xf32>
    %123 = vector.shape_cast %122 : vector<2x1x32xf32> to vector<2x32xf32>
    %124 = vector.shape_cast %121 : vector<2x32xf32> to vector<2x1x32xf32>
    tpu.vector_store %arg7[%c0_67, %c3_68, %c0_69], %124 {strides = array<i32>} : memref<2x4x32xf32, #tpu.memory_space<vmem>>, vector<2x1x32xf32>,
    return
  }
  func.func @transform_0(%arg0: i32, %arg1: i32) -> (i32, i32, i32) {
    %c0_i32 = arith.constant 0 : i32
    %c0_i32_0 = arith.constant 0 : i32
    return %arg1, %arg0, %c0_i32 : i32, i32, i32
  }
  func.func @transform_1(%arg0: i32, %arg1: i32) -> (i32, i32, i32) {
    %c0_i32 = arith.constant 0 : i32
    %c0_i32_0 = arith.constant 0 : i32
    %c0_i32_1 = arith.constant 0 : i32
    return %arg0, %c0_i32, %c0_i32_0 : i32, i32, i32
  }
  func.func @transform_2(%arg0: i32, %arg1: i32) -> (i32, i32, i32) {
    %c0_i32 = arith.constant 0 : i32
    %c0_i32_0 = arith.constant 0 : i32
    %c0_i32_1 = arith.constant 0 : i32
    return %arg0, %c0_i32, %c0_i32_0 : i32, i32, i32
  }
  func.func @transform_3(%arg0: i32, %arg1: i32) -> (i32, i32, i32) {
    %c0_i32 = arith.constant 0 : i32
    %c0_i32_0 = arith.constant 0 : i32
    %c0_i32_1 = arith.constant 0 : i32
    return %arg0, %c0_i32, %c0_i32_0 : i32, i32, i32
  }
  func.func @transform_4(%arg0: i32, %arg1: i32) -> (i32, i32, i32) {
    %c0_i32 = arith.constant 0 : i32
    %c0_i32_0 = arith.constant 0 : i32
    %c0_i32_1 = arith.constant 0 : i32
    return %arg0, %c0_i32, %c0_i32_0 : i32, i32, i32
  }
  func.func @transform_5(%arg0: i32, %arg1: i32) -> (i32, i32, i32) {
    %c0_i32 = arith.constant 0 : i32
    %c0_i32_0 = arith.constant 0 : i32
    return %arg1, %arg0, %c0_i32 : i32, i32, i32
  }
}

</mosaic_0001>

<bundles_post_ra>
// kernel: tpu_custom_call.1
= control target key start
LH: loop header
LB: loop body
LE: loop exit
PB: predicated region body
PF: predicated region fallthrough
CT: control target
= control target key end

     0   :  { %10 = vsyncpa [#allocation3], 0  ;;  %s858_s0 = inlined_call_operand.vmem [shape: f32[2,4,8], index: 0, kind: input, shape index: {}]   ;;  %s859_s1 = inlined_call_operand.vmem [shape: bf16[4,8,32], index: 1, kind: input, shape index: {}]   ;;  %s860_s2 = inlined_call_operand.hbm [shape: bf16[4,32,32], index: 2, kind: input, shape index: {}]   ;;  %s861_s3 = inlined_call_operand.hbm [shape: bf16[4,32,32], index: 3, kind: input, shape index: {}]   ;;  %s862_s4 = inlined_call_operand.vmem [shape: f32[4,3,32], index: 4, kind: input, shape index: {}]   ;;  %s863_s5 = inlined_call_operand.hbm [shape: f32[2,4,32], index: 5, kind: output, shape index: {}]  }
   0x1   :  { %11 = vsyncpa [#allocation6], 0 }
   0x2   :  { %12 = vsyncpa [#allocation4], 0  ;;  %s21_s20 = sshll.u32 %s860_s2, 4  ;;  %s714_s21 = smov [#allocation2]   ;;  %s22_s20 = int_to_ptr.hbm [resolvable:$true] %s21_s20 }
   0x3   :  { %s23_s22 = sshll.u32 %s714_s21, 4  ;;  %s34_s25 = sshll.u32 %s861_s3, 4  ;;  %s24_s22 = int_to_ptr.vmem [resolvable:$true] %s23_s22  ;;  %s35_s25 = int_to_ptr.hbm [resolvable:$true] %s34_s25 }
   0x4   :  { %s715_s26 = smov 64   ;;  %s716_s27 = smov 4  }
   0x5   :  { %29 = dma.hbm_to_vmem [thread:$0]  %s22_s20, 1024, %s24_s22, [#allocation3], %s715_s26, %s715_s26, %s716_s27  }
   0x6   :  { %s717_s28 = smov [#allocation5]  }
   0x7   :  { %s36_s29 = sshll.u32 %s717_s28, 4  ;;  %s37_s29 = int_to_ptr.vmem [resolvable:$true] %s36_s29 }
   0x8   :  { %42 = dma.hbm_to_vmem [thread:$0]  %s35_s25, 1024, %s37_s29, [#allocation6], %s715_s26, %s715_s26, %s716_s27  }
   0x9   :  { %708 = dma.done.wait [#allocation3], 1024  }
   0xa   :  { %709 = vsyncadd [#allocation3], 4294966272 }
   0xb   :  { %710 = dma.done.wait [#allocation6], 1024  }
   0xc   :  { %711 = vsyncadd [#allocation6], 4294966272  ;;  %vm76_vm0 = vcmask 1043456   ;;  %v539_v0 = vld [vmem:[%s859_s1 + $0x4] sm:$0xf]  ;;  %v604_v8 = vld [vmem:[#allocation2 + $0x18] sm:$0xff] }
   0xd   :  { %v170_v1 = vld [vmem:[%s858_s0 + $0x1] sm:$0x1]  ;;  %v171_v2 = vld [vmem:[%s858_s0 + $0x5] sm:$0x1]  ;;  %v188_v3 = vsel %vm76_vm0, %v539_v0, 0  ;;  %vm69_vm1 = vcmask 1041409  }
   0xe   :  { %v172_v4 = vpack.c.bf16 %v170_v1, %v170_v1  ;;  %v173_v5 = vpack.c.bf16 %v171_v2, %v171_v2  ;;  %v62_v6 = vld [vmem:[%s859_s1] sm:$0xf]  ;;  %197 = vmatpush.bf16.msra.mxu3 %v188_v3  ;;  %v59_v10 = vld [vmem:[%s858_s0 + $0x4] sm:$0x1]  ;;  %vm72_vm2 = vcmask 64512   ;;  %v603_v23 = vld [vmem:[#allocation2 + $0x10] sm:$0xff] }
   0xf   :  { %v58_v7 = vld [vmem:[%s858_s0] sm:$0x1]  ;;  %v78_v9 = vsel %vm76_vm0, %v62_v6, 0  ;;  %v61_v14 = vpack.c.bf16 %v59_v10, %v59_v10  ;;  %v600_v24 = vld [vmem:[#allocation2 + $0x8] sm:$0xff]  ;;  %v606_v25 = vld [vmem:[#allocation5 + $0x18] sm:$0xff]  ;;  %vm112_vm3 = vcmask 261120  }
  0x10   :  { %v60_v11 = vpack.c.bf16 %v58_v7, %v58_v7  ;;  %v179_v12 = vunpack.c.l.b16 %v172_v4  ;;  %v180_v13 = vunpack.c.l.b16 %v173_v5  ;;  %87 = vmatpush.bf16.msra.mxu0 %v78_v9  ;;  %122 = vmatpush.bf16.msra.mxu1 %v600_v24  ;;  %v599_v26 = vld [vmem:[#allocation2] sm:$0xff]  ;;  %v605_v41 = vld [vmem:[#allocation5 + $0x10] sm:$0xff]  ;;  %v579_v42 = vld [vmem:[%s859_s1 + $0xc] sm:$0xf]  ;;  %vm167_vm4 = vcmask 253952   ;;  %s506_s11 = sshll.u32 %s863_s5, 4  ;;  %s507_s11 = int_to_ptr.hbm [resolvable:$true] %s506_s11 }
  0x11   :  { %v67_v17 = vunpack.c.l.b16 %v61_v14  ;;  %v788_v27 = vld [vmem:[%s862_s4] sm:$0x7]  ;;  %v794_v29 = vld [vmem:[%s862_s4 + $0x4] sm:$0x7]  ;;  %v559_v43 = vld [vmem:[%s859_s1 + $0x8] sm:$0xf] }
  0x12   :  { %v181_v15 = vrot.slane %v180_v13, 7  ;;  %v66_v16 = vunpack.c.l.b16 %v60_v11  ;;  %268 = vmatpush.bf16.msrb.mxu3 %v606_v25  ;;  %v63_v28 = vperm.slane %v788_v27, 0  ;;  %v176_v31 = vperm.slane %v794_v29, 0  ;;  %v280_v44 = vld [vmem:[%s858_s0 + $0x2] sm:$0x1]  ;;  %v602_v57 = vld [vmem:[#allocation5 + $0x8] sm:$0xff] }
  0x13   :  { %v68_v19 = vrot.slane %v67_v17, 7  ;;  %v408_v45 = vsel %vm76_vm0, %v579_v42, 0  ;;  %v298_v46 = vsel %vm76_vm0, %v559_v43, 0  ;;  %v281_v47 = vld [vmem:[%s858_s0 + $0x6] sm:$0x1]  ;;  %v282_v48 = vpack.c.bf16 %v280_v44, %v280_v44  ;;  %157 = vmatpush.bf16.msra.mxu2 %v602_v57  ;;  %v608_v17 = vld [vmem:[#allocation2 + $0x28] sm:$0xff] }
  0x14   :  { %232 = vmatpush.bf16.msrb.mxu0 %v604_v8  ;;  %v182_v18 = vsel %vm69_vm1, %v181_v15, %v179_v12  ;;  %123 = vmatpush.bf16.msra.mxu1 %v599_v26  ;;  %v283_v49 = vpack.c.bf16 %v281_v47, %v281_v47  ;;  %v99_v55 = vperm.slane %v788_v27, 1  ;;  %v210_v58 = vperm.slane %v794_v29, 1  ;;  %v601_v60 = vld [vmem:[#allocation5] sm:$0xff]  ;;  %v830_v14 = vld [vmem:[%s862_s4 + $0x8] sm:$0x7]  ;;  %v611_v24 = vld [vmem:[#allocation2 + $0x30] sm:$0xff] }
  0x15   :  { %v183_v20 = vpack.c.b16 %v182_v18, %v182_v18  ;;  %v70_v21 = vsel %vm69_vm1, %v68_v19, %v66_v16  ;;  %v289_v50 = vunpack.c.l.b16 %v282_v48  ;;  %v391_v1 = vld [vmem:[%s858_s0 + $0x7] sm:$0x1]  ;;  %v390_v7 = vld [vmem:[%s858_s0 + $0x3] sm:$0x1]  ;;  %v286_v15 = vperm.slane %v830_v14, 0  ;;  %v612_v18 = vld [vmem:[#allocation2 + $0x38] sm:$0xff] }
  0x16   :  { %v71_v22 = vpack.c.b16 %v70_v21, %v70_v21  ;;  %269 = vmatpush.bf16.msrb.mxu3 %v605_v41  ;;  %v290_v51 = vunpack.c.l.b16 %v283_v49  ;;  %v393_v5 = vpack.c.bf16 %v391_v1, %v391_v1  ;;  %v392_v8 = vpack.c.bf16 %v390_v7, %v390_v7  ;;  %v614_v26 = vld [vmem:[#allocation5 + $0x38] sm:$0xff]  ;;  %v609_v47 = vld [vmem:[#allocation5 + $0x20] sm:$0xff] }
  0x17   :  { %540 = vmatmul.msk.bf16.vlgmr.msra.gmra.mxu3 %vm72_vm2, %v183_v20  ;;  %158 = vmatpush.bf16.msra.mxu2 %v601_v60  ;;  %v607_v20 = vld [vmem:[#allocation2 + $0x20] sm:$0xff]  ;;  %v135_v25 = vperm.slane %v788_v27, 2  ;;  %v320_v43 = vperm.slane %v830_v14, 1 }
  0x18   :  { %520 = vmatmul.msk.bf16.vlgmr.msra.gmra.mxu0 %vm72_vm2, %v71_v22  ;;  %307 = vmatpush.bf16.msrb.mxu1 %v298_v46  ;;  %v291_v52 = vrot.slane %v290_v51, 7  ;;  %v400_v9 = vunpack.c.l.b16 %v393_v5  ;;  %v399_v10 = vunpack.c.l.b16 %v392_v8  ;;  %v610_v46 = vld [vmem:[#allocation5 + $0x28] sm:$0xff] }
  0x19   :  { %233 = vmatpush.bf16.msrb.mxu0 %v603_v23 }
  0x1a   :  { %417 = vmatpush.bf16.msra.mxu3 %v408_v45  ;;  %v292_v53 = vsel %vm69_vm1, %v291_v52, %v289_v50  ;;  %v401_v11 = vrot.slane %v400_v9, 7  ;;  %v613_v50 = vld [vmem:[#allocation5 + $0x30] sm:$0xff] }
  0x1b   :  { %v293_v54 = vpack.c.b16 %v292_v53, %v292_v53  ;;  %342 = vmatpush.bf16.msrb.mxu2 %v608_v17 }
  0x1c   :  { %v402_v12 = vsel %vm69_vm1, %v401_v11, %v399_v10 }
  0x1d   :  { %v403_v13 = vpack.c.b16 %v402_v12, %v402_v12  ;;  %378 = vmatpush.bf16.msra.mxu0 %v610_v46 }
  0x1f   :  { %343 = vmatpush.bf16.msrb.mxu2 %v607_v20 }
  0x21   :  { %379 = vmatpush.bf16.msra.mxu0 %v609_v47 }
  0x95   :  { %v89_v30 = vpop.f32.mrf.mxu0 }
  0x96   :  { %v90_v32 = vadd.f32 %v89_v30, %v63_v28  ;;  %v246_v28 = vperm.slane %v794_v29, 2  ;;  %v57_v29 = vld [vmem:[%s862_s4 + $0xc] sm:$0x7]  ;;  %s718_s4 = smov [#allocation7]  }
  0x97   :  { %v430_v52 = vperm.slane %v57_v29, 1  ;;  %s504_s8 = sshll.u32 %s718_s4, 4  ;;  %s505_s8 = int_to_ptr.vmem [resolvable:$true] %s504_s8 }
  0x98   :  { %620 = vtanh.f32 %v90_v32 }
  0x9a   :  { %v199_v33 = vpop.f32.mrf.mxu3 }
  0x9b   :  { %v200_v34 = vadd.f32 %v199_v33, %v176_v31 }
  0x9d   :  { %622 = vtanh.f32 %v200_v34  ;;  %v91_v35 = vpop.f32.mrf.mxu0 }
  0x9e   :  { %v621_v36 = vpop.eup %620 }
  0x9f   :  { %v94_v37 = vpack.c.bf16 %v621_v36, %v621_v36 }
  0xa1   :  { %529 = vmatmul.msk.bf16.vlgmr.msra.gmra.mxu1 %vm112_vm3, %v94_v37  ;;  %v396_v37 = vperm.slane %v57_v29, 0 }
  0xa2   :  { %v201_v38 = vpop.f32.mrf.mxu3  ;;  %452 = vmatpush.bf16.msra.mxu1 %v612_v18 }
  0xa3   :  { %v623_v39 = vpop.eup %622 }
  0xa4   :  { %v204_v40 = vpack.c.bf16 %v623_v39, %v623_v39 }
  0xa6   :  { %549 = vmatmul.msk.bf16.vlgmr.msrb.gmra.mxu0 %vm112_vm3, %v204_v40  ;;  %453 = vmatpush.bf16.msra.mxu1 %v611_v24 }
  0xb1   :  { %560 = vmatmul.msk.bf16.vlgmr.msrb.gmra.mxu1 %vm72_vm2, %v293_v54 }
 0x11e   :  { %v125_v56 = vpop.f32.mrf.mxu1 }
 0x11f   :  { %v126_v59 = vadd.f32 %v125_v56, %v99_v55 }
 0x121   :  { %624 = vtanh.f32 %v126_v59 }
 0x123   :  { %v235_v61 = vpop.f32.mrf.mxu0 }
 0x124   :  { %v236_v62 = vadd.f32 %v235_v61, %v210_v58  ;;  %v356_v58 = vperm.slane %v830_v14, 2 }
 0x126   :  { %626 = vtanh.f32 %v236_v62  ;;  %v127_v63 = vpop.f32.mrf.mxu1 }
 0x127   :  { %v625_v0 = vpop.eup %624  ;;  %v466_v63 = vperm.slane %v57_v29, 2 }
 0x128   :  { %v130_v2 = vpack.c.bf16 %v625_v0, %v625_v0 }
 0x12a   :  { %538 = vmatmul.msk.bf16.vlgmr.msra.gmra.mxu2 %vm112_vm3, %v130_v2 }
 0x12b   :  { %v237_v3 = vpop.f32.mrf.mxu0  ;;  %488 = vmatpush.bf16.msra.mxu2 %v614_v26 }
 0x12c   :  { %v627_v4 = vpop.eup %626 }
 0x12d   :  { %v240_v6 = vpack.c.bf16 %v627_v4, %v627_v4 }
 0x12e   :  { %v309_v16 = vpop.f32.mrf.mxu1 }
 0x12f   :  { %558 = vmatmul.msk.bf16.vlgmr.msrb.gmra.mxu3 %vm112_vm3, %v240_v6  ;;  %v310_v19 = vadd.f32 %v309_v16, %v286_v15  ;;  %489 = vmatpush.bf16.msra.mxu2 %v613_v50 }
 0x131   :  { %628 = vtanh.f32 %v310_v19 }
 0x136   :  { %v311_v21 = vpop.f32.mrf.mxu1 }
 0x137   :  { %v629_v22 = vpop.eup %628 }
 0x138   :  { %v314_v23 = vpack.c.bf16 %v629_v22, %v629_v22 }
 0x13a   :  { %569 = vmatmul.msk.bf16.vlgmr.msrb.gmra.mxu2 %vm112_vm3, %v314_v23 }
 0x13f   :  { %580 = vmatmul.msk.bf16.vlgmr.msra.gmra.mxu3 %vm72_vm2, %v403_v13 }
 0x1ad   :  { %v160_v30 = vpop.f32.mrf.mxu2 }
 0x1ae   :  { %v161_v31 = vadd.f32 %v160_v30, %v135_v25 }
 0x1b0   :  { %v165_v33 = vrot.slane %v161_v31, 1  ;;  %168 = vst.msk [vmem:[#allocation7] sm:$0x1] %vm167_vm4, %v161_v31 }
 0x1b2   :  { %v271_v32 = vpop.f32.mrf.mxu3  ;;  %169 = vst.msk [vmem:[#allocation7 + $0x4] sm:$0x1] %vm167_vm4, %v165_v33 }
 0x1b3   :  { %v272_v34 = vadd.f32 %v271_v32, %v246_v28 }
 0x1b5   :  { %v276_v35 = vrot.slane %v272_v34, 1  ;;  %278 = vst.msk [vmem:[#allocation7 + $0x1] sm:$0x1] %vm167_vm4, %v272_v34  ;;  %v162_v27 = vpop.f32.mrf.mxu2 }
 0x1b7   :  { %279 = vst.msk [vmem:[#allocation7 + $0x5] sm:$0x1] %vm167_vm4, %v276_v35 }
 0x1ba   :  { %v273_v36 = vpop.f32.mrf.mxu3 }
 0x1bd   :  { %v345_v44 = vpop.f32.mrf.mxu2 }
 0x1be   :  { %v346_v45 = vadd.f32 %v345_v44, %v320_v43 }
 0x1c2   :  { %v419_v38 = vpop.f32.mrf.mxu3 }
 0x1c3   :  { %v420_v39 = vadd.f32 %v419_v38, %v396_v37 }
 0x1c5   :  { %630 = vtanh.f32 %v420_v39  ;;  %v347_v48 = vpop.f32.mrf.mxu2 }
 0x1c6   :  { %632 = vtanh.f32 %v346_v45 }
 0x1ca   :  { %v421_v40 = vpop.f32.mrf.mxu3 }
 0x1cb   :  { %v631_v41 = vpop.eup %630 }
 0x1cc   :  { %v424_v42 = vpack.c.bf16 %v631_v41, %v631_v41  ;;  %v633_v49 = vpop.eup %632 }
 0x1cd   :  { %v350_v51 = vpack.c.bf16 %v633_v49, %v633_v49 }
 0x1ce   :  { %589 = vmatmul.msk.bf16.vlgmr.msra.gmra.mxu1 %vm112_vm3, %v424_v42 }
 0x1cf   :  { %578 = vmatmul.msk.bf16.vlgmr.msra.gmra.mxu0 %vm112_vm3, %v350_v51 }
 0x24b   :  { %v455_v53 = vpop.f32.mrf.mxu1 }
 0x24c   :  { %v456_v54 = vadd.f32 %v455_v53, %v430_v52  ;;  %v381_v59 = vpop.f32.mrf.mxu0 }
 0x24d   :  { %v382_v60 = vadd.f32 %v381_v59, %v356_v58 }
 0x24e   :  { %634 = vtanh.f32 %v456_v54 }
 0x24f   :  { %v386_v61 = vrot.slane %v382_v60, 1  ;;  %388 = vst.msk [vmem:[#allocation7 + $0x2] sm:$0x1] %vm167_vm4, %v382_v60 }
 0x251   :  { %389 = vst.msk [vmem:[#allocation7 + $0x6] sm:$0x1] %vm167_vm4, %v386_v61 }
 0x253   :  { %v457_v55 = vpop.f32.mrf.mxu1 }
 0x254   :  { %v635_v56 = vpop.eup %634  ;;  %v383_v62 = vpop.f32.mrf.mxu0 }
 0x255   :  { %v460_v57 = vpack.c.bf16 %v635_v56, %v635_v56 }
 0x257   :  { %598 = vmatmul.msk.bf16.vlgmr.msra.gmra.mxu2 %vm112_vm3, %v460_v57 }
 0x2da   :  { %v491_v0 = vpop.f32.mrf.mxu2 }
 0x2db   :  { %v492_v1 = vadd.f32 %v491_v0, %v466_v63 }
 0x2dd   :  { %v496_v2 = vrot.slane %v492_v1, 1  ;;  %498 = vst.msk [vmem:[#allocation7 + $0x3] sm:$0x1] %vm167_vm4, %v492_v1 }
 0x2df   :  { %499 = vst.msk [vmem:[#allocation7 + $0x7] sm:$0x1] %vm167_vm4, %v496_v2 }
 0x2e0   :  { %512 = dma.vmem_to_hbm [thread:$0]  %s505_s8, 128, %s507_s11, [#allocation4], %s715_s26, %s715_s26, %s716_s27  }
 0x2e2   :  { %v493_v3 = vpop.f32.mrf.mxu2 }
 0x2e3   :  { %712 = dma.done.wait [#allocation4], 128  }
 0x2e4   :  { %713 = vsyncadd [#allocation4], 4294967168 }
 0x2e5   :  { %517 = vsyncpa [#allocation3], 1 }
 0x2e6   :  { %518 = vsyncpa [#allocation6], 1 }
 0x2e7   :  { %519 = vsyncpa [#allocation4], 1 }

</bundles_post_ra>
